<compile_context>
chip_gen: v5e
topology: v5e:2x2
jax: 0.10.0
libtpu: 0.0.40
codegen_flags: <defaults>
</compile_context>

<pallas_src>
import functools

import jax
import jax.numpy as jnp
from jax.experimental import pallas as pl
from jax.experimental.pallas import tpu as pltpu

_SUBLANE = 8
_NEG_BIG = -1e30  # acts as -inf for padded class logits without inf/NaN arithmetic


def _cdiv(a, b):
    return -(-a // b)


def _round_up(n, m):
    return _cdiv(n, m) * m


def posenet_kernel(x_ref, w1_ref, b1_ref, w2_ref, b2_ref, w3_ref, b3_ref, o_ref):
    """One batch tile: fc1+relu -> fc2+relu -> fc3 -> softmax.

    Dots run in bf16 on the MXU with f32 accumulation; biases / relu / softmax
    stay in f32 (v5e has no bf16 VALU/EUP, and the -1e30 sentinel must not be
    rounded).
    """
    bf16 = jnp.bfloat16
    x = x_ref[...].astype(bf16)                                            # (TB, 99)

    # fc1 + relu
    h1 = jnp.dot(x, w1_ref[...], preferred_element_type=jnp.float32) + b1_ref[...]
    h1 = jnp.maximum(h1, 0.0)                                              # (TB, 128) f32
    # TODO(synk): nn.Dropout(0.2) is identity in eval mode; training-mode masking omitted.

    # fc2 + relu
    h2 = jnp.dot(h1.astype(bf16), w2_ref[...],
                 preferred_element_type=jnp.float32) + b2_ref[...]
    h2 = jnp.maximum(h2, 0.0)                                              # (TB, 64) f32

    # fc3   (padded class columns: zero weights + -1e30 bias -> exp underflows to 0)
    logits = jnp.dot(h2.astype(bf16), w3_ref[...],
                     preferred_element_type=jnp.float32) + b3_ref[...]     # (TB, 8) f32

    # softmax over the (lightly padded) class axis == softmax over the real classes
    m = jnp.max(logits, axis=1, keepdims=True)
    e = jnp.exp(logits - m)
    s = jnp.sum(e, axis=1, keepdims=True)
    o_ref[...] = (e * pl.reciprocal(s, approx=True)).astype(o_ref.dtype)   # EUP divide


def prepare_params(params, *, weight_dtype=jnp.bfloat16):
    """One-time (outside the hot path) cast + class-dim padding of the params.

    Only w3/b3 need padding (num_classes -> multiple of 8); everything else is
    passed through unpadded (full-dim BlockSpec blocks are legal).
    """
    w1, b1, w2, b2, w3, b3 = params
    c = w3.shape[1]
    c_p = _round_up(c, _SUBLANE)                   # 3 -> 8
    f32 = jnp.float32
    w3p = jnp.zeros((w3.shape[0], c_p), weight_dtype).at[:, :c].set(
        w3.astype(weight_dtype))
    b3p = jnp.full((1, c_p), _NEG_BIG, f32).at[:, :c].set(
        b3.reshape(1, -1).astype(f32))
    return (w1.astype(weight_dtype), b1.reshape(1, -1).astype(f32),
            w2.astype(weight_dtype), b2.reshape(1, -1).astype(f32),
            w3p, b3p)


@functools.partial(jax.jit, static_argnames=("num_classes", "tile_b"))
def posenet_forward(x, padded_params, *, num_classes=3, tile_b=1024):
    """Runs the fused kernel on unpadded x; slices the lightly padded output back."""
    w1, b1, w2, b2, w3p, b3p = padded_params
    B, in_f = x.shape
    h1f = w1.shape[1]
    h2f = w2.shape[1]
    c_p = w3p.shape[1]

    # Batch tile: large (amortize ~0.35us/step grid overhead) but capped so the
    # grid has >=2 steps for mid/large batches (both TensorCores on v7x).
    tb = max(_SUBLANE, min(tile_b, _round_up(_cdiv(B, 2), _SUBLANE)))
    b_p = _round_up(B, tb)
    if b_p != B:
        # Zero rows keep the padded tail finite; it is sliced off below.
        x = jnp.pad(x, ((0, b_p - B), (0, 0)))

    grid = (b_p // tb,)
    batch_spec = lambda shape: pl.BlockSpec(shape, lambda i: (i, 0))
    const_spec = lambda shape: pl.BlockSpec(shape, lambda i: (0, 0))

    itemsize = lambda a: a.size * a.dtype.itemsize
    cost = pl.CostEstimate(
        flops=2 * b_p * (in_f * h1f + h1f * h2f + h2f * c_p),
        bytes_accessed=itemsize(x) + sum(itemsize(p) for p in padded_params)
        + b_p * c_p * 4,
        transcendentals=b_p * (c_p + 1),
    )

    out_p = pl.pallas_call(
        posenet_kernel,
        out_shape=jax.ShapeDtypeStruct((b_p, c_p), jnp.float32),
        grid=grid,
        in_specs=[
            batch_spec((tb, in_f)),                 # x tile, streamed
            const_spec((in_f, h1f)), const_spec((1, h1f)),   # fc1 (VMEM-resident)
            const_spec((h1f, h2f)), const_spec((1, h2f)),    # fc2
            const_spec((h2f, c_p)), const_spec((1, c_p)),    # fc3 (class-padded to 8)
        ],
        out_specs=batch_spec((tb, c_p)),
        compiler_params=pltpu.CompilerParams(
            dimension_semantics=("parallel",),
            # headroom for larger tiles on v5e (16 MiB default scoped VMEM);
            # equals the default on v6e/v7x.
            vmem_limit_bytes=32 * 1024 * 1024,
        ),
        cost_estimate=cost,
    )(x, w1, b1, w2, b2, w3p, b3p)

    return out_p[:B, :num_classes]


def init_params(key, input_size=99, hidden_size=128, num_classes=3):
    """Deterministic init mimicking PyTorch nn.Linear default (U[-1/sqrt(fan_in), +1/sqrt(fan_in)])."""
    dims = [(input_size, hidden_size),
            (hidden_size, hidden_size // 2),
            (hidden_size // 2, num_classes)]
    params = []
    for (fan_in, fan_out) in dims:
        key, kw, kb = jax.random.split(key, 3)
        bound = 1.0 / jnp.sqrt(jnp.float32(fan_in))
        w = jax.random.uniform(kw, (fan_in, fan_out), jnp.float32, -bound, bound)
        b = jax.random.uniform(kb, (1, fan_out), jnp.float32, -bound, bound)
        params += [w, b]
    return tuple(params)


def posenet_reference(x, params):
    """Pure-JAX f32 reference of the PyTorch forward (eval mode)."""
    w1, b1, w2, b2, w3, b3 = params
    h1 = jax.nn.relu(x @ w1 + b1)
    h2 = jax.nn.relu(h1 @ w2 + b2)
    return jax.nn.softmax(h2 @ w3 + b3, axis=1)


if __name__ == "__main__":
    key = jax.random.PRNGKey(0)
    k_x, k_p, k_x2 = jax.random.split(key, 3)

    B, INPUT, HIDDEN, CLASSES = 8, 99, 128, 3
    x = jax.random.normal(k_x, (B, INPUT), jnp.float32)
    params = init_params(k_p, INPUT, HIDDEN, CLASSES)
    padded_params = prepare_params(params)          # one-time pad/cast, outside jit

    out = jax.block_until_ready(posenet_forward(x, padded_params, num_classes=CLASSES))
    ref = posenet_reference(x, params)
    assert out.shape == (B, CLASSES)
    assert jnp.allclose(jnp.sum(out, axis=1), 1.0, atol=5e-3)
    # bf16 matmuls vs f32 reference: allow slightly looser tolerance.
    assert jnp.allclose(out, ref, atol=1e-2, rtol=1e-2)

    # Ragged batch -> multi-step grid (2 steps), padded tail rows sliced off.
    B2 = 20
    x2 = jax.random.normal(k_x2, (B2, INPUT), jnp.float32)
    out2 = jax.block_until_ready(posenet_forward(x2, padded_params, num_classes=CLASSES))
    ref2 = posenet_reference(x2, params)
    assert out2.shape == (B2, CLASSES)
    assert jnp.allclose(jnp.sum(out2, axis=1), 1.0, atol=5e-3)
    assert jnp.allclose(out2, ref2, atol=1e-2, rtol=1e-2)

    print("KERNEL_OK")
</pallas_src>

<mosaic_0001>
module attributes {stable_mosaic.version = 11 : i64} {
  func.func @posenet_kernel(%arg0: i32, %arg1: memref<8x99xf32, #tpu.memory_space<vmem>>, %arg2: memref<99x128xbf16, #tpu.memory_space<vmem>>, %arg3: memref<1x128xf32, #tpu.memory_space<vmem>>, %arg4: memref<128x64xbf16, #tpu.memory_space<vmem>>, %arg5: memref<1x64xf32, #tpu.memory_space<vmem>>, %arg6: memref<64x8xbf16, #tpu.memory_space<vmem>>, %arg7: memref<1x8xf32, #tpu.memory_space<vmem>>, %arg8: memref<8x8xf32, #tpu.memory_space<vmem>>) attributes {dimension_semantics = [#tpu.dimension_semantics<parallel>], iteration_bounds = array<i64: 1>, scalar_prefetch = 0 : i64, scratch_operands = 0 : i64, tpu.core_type = #tpu.core_type<tc>, window_params = [{transform_indices = @transform_0, window_bounds = array<i64: 8, 99>}, {pipeline_mode = #tpu.pipeline_mode<synchronous>, transform_indices = @transform_1, window_bounds = array<i64: 99, 128>}, {pipeline_mode = #tpu.pipeline_mode<synchronous>, transform_indices = @transform_2, window_bounds = array<i64: 1, 128>}, {pipeline_mode = #tpu.pipeline_mode<synchronous>, transform_indices = @transform_3, window_bounds = array<i64: 128, 64>}, {pipeline_mode = #tpu.pipeline_mode<synchronous>, transform_indices = @transform_4, window_bounds = array<i64: 1, 64>}, {pipeline_mode = #tpu.pipeline_mode<synchronous>, transform_indices = @transform_5, window_bounds = array<i64: 64, 8>}, {pipeline_mode = #tpu.pipeline_mode<synchronous>, transform_indices = @transform_6, window_bounds = array<i64: 1, 8>}, {transform_indices = @transform_7, window_bounds = array<i64: 8, 8>}]} {
    %c0 = arith.constant 0 : index
    %c0_0 = arith.constant 0 : index
    %0 = vector.load %arg1[%c0, %c0_0] : memref<8x99xf32, #tpu.memory_space<vmem>>, vector<8x99xf32>
    %1 = arith.truncf %0 : vector<8x99xf32> to vector<8x99xbf16>
    %c0_1 = arith.constant 0 : index
    %c0_2 = arith.constant 0 : index
    %2 = vector.load %arg2[%c0_1, %c0_2] : memref<99x128xbf16, #tpu.memory_space<vmem>>, vector<99x128xbf16>
    %cst = arith.constant dense<0.000000e+00> : vector<8x128xf32>
    %3 = tpu.matmul %1, %2, %cst {dimension_numbers = #tpu.dot_dimension_numbers<[1], [0], [0], [1], [0, 0, 1, 1], [], []>} : vector<8x99xbf16>, vector<99x128xbf16>, vector<8x128xf32> -> vector<8x128xf32>
    %c0_3 = arith.constant 0 : index
    %c0_4 = arith.constant 0 : index
    %4 = vector.load %arg3[%c0_3, %c0_4] : memref<1x128xf32, #tpu.memory_space<vmem>>, vector<1x128xf32>
    %5 = vector.broadcast %4 : vector<1x128xf32> to vector<8x128xf32>
    %6 = arith.addf %3, %5 : vector<8x128xf32>
    %cst_5 = arith.constant 0.000000e+00 : f32
    %7 = vector.broadcast %cst_5 : f32 to vector<8x128xf32>
    %8 = arith.maximumf %6, %7 : vector<8x128xf32>
    %9 = arith.truncf %8 : vector<8x128xf32> to vector<8x128xbf16>
    %c0_6 = arith.constant 0 : index
    %c0_7 = arith.constant 0 : index
    %10 = vector.load %arg4[%c0_6, %c0_7] : memref<128x64xbf16, #tpu.memory_space<vmem>>, vector<128x64xbf16>
    %cst_8 = arith.constant dense<0.000000e+00> : vector<8x64xf32>
    %11 = tpu.matmul %9, %10, %cst_8 {dimension_numbers = #tpu.dot_dimension_numbers<[1], [0], [0], [1], [0, 0, 1, 1], [], []>} : vector<8x128xbf16>, vector<128x64xbf16>, vector<8x64xf32> -> vector<8x64xf32>
    %c0_9 = arith.constant 0 : index
    %c0_10 = arith.constant 0 : index
    %12 = vector.load %arg5[%c0_9, %c0_10] : memref<1x64xf32, #tpu.memory_space<vmem>>, vector<1x64xf32>
    %13 = vector.broadcast %12 : vector<1x64xf32> to vector<8x64xf32>
    %14 = arith.addf %11, %13 : vector<8x64xf32>
    %cst_11 = arith.constant 0.000000e+00 : f32
    %15 = vector.broadcast %cst_11 : f32 to vector<8x64xf32>
    %16 = arith.maximumf %14, %15 : vector<8x64xf32>
    %17 = arith.truncf %16 : vector<8x64xf32> to vector<8x64xbf16>
    %c0_12 = arith.constant 0 : index
    %c0_13 = arith.constant 0 : index
    %18 = vector.load %arg6[%c0_12, %c0_13] : memref<64x8xbf16, #tpu.memory_space<vmem>>, vector<64x8xbf16>
    %cst_14 = arith.constant dense<0.000000e+00> : vector<8x8xf32>
    %19 = tpu.matmul %17, %18, %cst_14 {dimension_numbers = #tpu.dot_dimension_numbers<[1], [0], [0], [1], [0, 0, 1, 1], [], []>} : vector<8x64xbf16>, vector<64x8xbf16>, vector<8x8xf32> -> vector<8x8xf32>
    %c0_15 = arith.constant 0 : index
    %c0_16 = arith.constant 0 : index
    %20 = vector.load %arg7[%c0_15, %c0_16] : memref<1x8xf32, #tpu.memory_space<vmem>>, vector<1x8xf32>
    %21 = vector.broadcast %20 : vector<1x8xf32> to vector<8x8xf32>
    %22 = arith.addf %19, %21 : vector<8x8xf32>
    %cst_17 = arith.constant dense<0xFF800000> : vector<8xf32>
    %23 = vector.multi_reduction <maximumf>, %22, %cst_17 [1] : vector<8x8xf32> to vector<8xf32>
    %24 = vector.shape_cast %23 : vector<8xf32> to vector<8x1xf32>
    %25 = vector.broadcast %24 : vector<8x1xf32> to vector<8x8xf32>
    %26 = arith.subf %22, %25 : vector<8x8xf32>
    %27 = math.exp %26 : vector<8x8xf32>
    %cst_18 = arith.constant dense<0.000000e+00> : vector<8xf32>
    %28 = vector.multi_reduction <add>, %27, %cst_18 [1] : vector<8x8xf32> to vector<8xf32>
    %29 = vector.shape_cast %28 : vector<8xf32> to vector<8x1xf32>
    %30 = tpu.reciprocal %29 {approx = true} : vector<8x1xf32> -> vector<8x1xf32>
    %31 = vector.broadcast %30 : vector<8x1xf32> to vector<8x8xf32>
    %32 = arith.mulf %27, %31 : vector<8x8xf32>
    %c0_19 = arith.constant 0 : index
    %c0_20 = arith.constant 0 : index
    %33 = vector.load %arg8[%c0_19, %c0_20] : memref<8x8xf32, #tpu.memory_space<vmem>>, vector<8x8xf32>
    tpu.vector_store %arg8[%c0_19, %c0_20], %32 {strides = array<i32>} : memref<8x8xf32, #tpu.memory_space<vmem>>, vector<8x8xf32>,
    return
  }
  func.func @transform_0(%arg0: i32) -> (i32, i32) {
    %c0_i32 = arith.constant 0 : i32
    %c0_i32_0 = arith.constant 0 : i32
    return %arg0, %c0_i32 : i32, i32
  }
  func.func @transform_1(%arg0: i32) -> (i32, i32) {
    %c0_i32 = arith.constant 0 : i32
    %c0_i32_0 = arith.constant 0 : i32
    %c0_i32_1 = arith.constant 0 : i32
    return %c0_i32, %c0_i32_0 : i32, i32
  }
  func.func @transform_2(%arg0: i32) -> (i32, i32) {
    %c0_i32 = arith.constant 0 : i32
    %c0_i32_0 = arith.constant 0 : i32
    %c0_i32_1 = arith.constant 0 : i32
    return %c0_i32, %c0_i32_0 : i32, i32
  }
  func.func @transform_3(%arg0: i32) -> (i32, i32) {
    %c0_i32 = arith.constant 0 : i32
    %c0_i32_0 = arith.constant 0 : i32
    %c0_i32_1 = arith.constant 0 : i32
    return %c0_i32, %c0_i32_0 : i32, i32
  }
  func.func @transform_4(%arg0: i32) -> (i32, i32) {
    %c0_i32 = arith.constant 0 : i32
    %c0_i32_0 = arith.constant 0 : i32
    %c0_i32_1 = arith.constant 0 : i32
    return %c0_i32, %c0_i32_0 : i32, i32
  }
  func.func @transform_5(%arg0: i32) -> (i32, i32) {
    %c0_i32 = arith.constant 0 : i32
    %c0_i32_0 = arith.constant 0 : i32
    %c0_i32_1 = arith.constant 0 : i32
    return %c0_i32, %c0_i32_0 : i32, i32
  }
  func.func @transform_6(%arg0: i32) -> (i32, i32) {
    %c0_i32 = arith.constant 0 : i32
    %c0_i32_0 = arith.constant 0 : i32
    %c0_i32_1 = arith.constant 0 : i32
    return %c0_i32, %c0_i32_0 : i32, i32
  }
  func.func @transform_7(%arg0: i32) -> (i32, i32) {
    %c0_i32 = arith.constant 0 : i32
    %c0_i32_0 = arith.constant 0 : i32
    return %arg0, %c0_i32 : i32, i32
  }
}

</mosaic_0001>

<bundles_post_ra>
// kernel: posenet_forward.1
= control target key start
LH: loop header
LB: loop body
LE: loop exit
PB: predicated region body
PF: predicated region fallthrough
CT: control target
= control target key end

     0   :  { %vm89_vm0 = vcmask 1040384   ;;  %vm90_vm1 = vcmask 1041408   ;;  %v364_v1 = vmov 65535   ;;  %vm85_vm2 = vcmask 809984   ;;  %s480_s1 = inlined_call_operand.vmem [shape: bf16[99,128], index: 1, kind: input, shape index: {}]   ;;  %s481_s3 = inlined_call_operand.vmem [shape: bf16[128,64], index: 3, kind: input, shape index: {}]   ;;  %s482_s2 = inlined_call_operand.vmem [shape: f32[1,128], index: 2, kind: input, shape index: {}]   ;;  %s483_s0 = inlined_call_operand.vmem [shape: f32[8,99], index: 0, kind: input, shape index: {}]   ;;  %s484_s4 = inlined_call_operand.vmem [shape: f32[1,64], index: 4, kind: input, shape index: {}]   ;;  %s485_s5 = inlined_call_operand.vmem [shape: bf16[64,8], index: 5, kind: input, shape index: {}]   ;;  %s486_s6 = inlined_call_operand.vmem [shape: f32[1,8], index: 6, kind: input, shape index: {}]   ;;  %s487_s7 = inlined_call_operand.vmem [shape: f32[8,8], index: 7, kind: output, shape index: {}]  }
   0x1   :  { %v41_v0 = vld [vmem:[%s480_s1 + $0x30] sm:$0x3]  ;;  %v91_v2 = vsel %vm89_vm0, 4294967295, %v364_v1  ;;  %v351_v5 = vld [vmem:[%s481_s3 + $0x38] sm:$0xff]  ;;  %v343_v9 = vld [vmem:[%s480_s1 + $0x28] sm:$0xff]  ;;  %vm230_vm3 = vcmask 523264  }
   0x2   :  { %v71_v3 = vunpack.c.l.b16 %v41_v0  ;;  %v92_v4 = vsel %vm90_vm1, %v91_v2, 0  ;;  %179 = vmatpush.bf16.msra.mxu1 %v351_v5  ;;  %v350_v7 = vld [vmem:[%s481_s3 + $0x30] sm:$0xff]  ;;  %v349_v10 = vld [vmem:[%s481_s3 + $0x28] sm:$0xff]  ;;  %v342_v11 = vld [vmem:[%s480_s1 + $0x20] sm:$0xff]  ;;  %vm247_vm4 = vcmask 64512  }
   0x3   :  { %v348_v12 = vld [vmem:[%s481_s3 + $0x20] sm:$0xff]  ;;  %v341_v13 = vld [vmem:[%s480_s1 + $0x18] sm:$0xff]  ;;  %v340_v15 = vld [vmem:[%s480_s1 + $0x10] sm:$0xff] }
   0x4   :  { %v78_v6 = vpack.c.b16 %v71_v3, %v71_v3  ;;  %v347_v14 = vld [vmem:[%s481_s3 + $0x18] sm:$0xff]  ;;  %v346_v16 = vld [vmem:[%s481_s3 + $0x10] sm:$0xff]  ;;  %v339_v17 = vld [vmem:[%s480_s1 + $0x8] sm:$0xff] }
   0x5   :  { %v338_v18 = vld [vmem:[%s480_s1] sm:$0xff]  ;;  %v345_v21 = vld [vmem:[%s481_s3 + $0x8] sm:$0xff]  ;;  %v355_v23 = vld [vmem:[%s485_s5 + $0x18] sm:$0xff] }
   0x6   :  { %v94_v8 = vand.u32 %v92_v4, %v78_v6  ;;  %180 = vmatpush.bf16.msra.mxu1 %v350_v7  ;;  %v27_v19 = vld [vmem:[%s483_s0] sm:$0xff]  ;;  %238 = vmatpush.bf16.msra.mxu2 %v355_v23  ;;  %v354_v24 = vld [vmem:[%s485_s5 + $0x10] sm:$0xff]  ;;  %v353_v31 = vld [vmem:[%s485_s5 + $0x8] sm:$0xff] }
   0x7   :  { %v28_v20 = vpack.c.bf16 %v27_v19, %v27_v19  ;;  %v344_v22 = vld [vmem:[%s481_s3] sm:$0xff] }
   0x8   :  { %97 = vmatpush.bf16.msra.mxu0 %v94_v8  ;;  %v357_v25 = vld [vmem:[%s482_s2] ss:$0 sm:$0xff] }
   0x9   :  { %v352_v32 = vld [vmem:[%s485_s5] sm:$0xff] }
   0xa   :  { %181 = vmatpush.bf16.msra.mxu1 %v349_v10  ;;  %239 = vmatpush.bf16.msra.mxu2 %v354_v24  ;;  %v358_v33 = vld [vmem:[%s484_s4] ss:$0 sm:$0xff] }
   0xb   :  { %v359_v39 = vld [vmem:[%s486_s6] ss:$0 sm:$0xff] }
   0xc   :  { %98 = vmatpush.bf16.msra.mxu0 %v343_v9 }
   0xe   :  { %182 = vmatpush.bf16.msra.mxu1 %v348_v12  ;;  %240 = vmatpush.bf16.msra.mxu2 %v353_v31 }
  0x10   :  { %99 = vmatpush.bf16.msra.mxu0 %v342_v11 }
  0x12   :  { %183 = vmatpush.bf16.msra.mxu1 %v347_v14  ;;  %241 = vmatpush.bf16.msra.mxu2 %v352_v32 }
  0x14   :  { %100 = vmatpush.bf16.msra.mxu0 %v341_v13 }
  0x16   :  { %184 = vmatpush.bf16.msra.mxu1 %v346_v16 }
  0x18   :  { %101 = vmatpush.bf16.msra.mxu0 %v340_v15 }
  0x1a   :  { %185 = vmatpush.bf16.msra.mxu1 %v345_v21 }
  0x1c   :  { %102 = vmatpush.bf16.msra.mxu0 %v339_v17 }
  0x1e   :  { %186 = vmatpush.bf16.msra.mxu1 %v344_v22 }
  0x20   :  { %103 = vmatpush.bf16.msra.mxu0 %v338_v18 }
  0x23   :  { %288 = vmatmul.msk.bf16.vlgmr.msra.gmra.mxu0 %vm85_vm2, %v28_v20 }
  0xa0   :  { %v105_v26 = vpop.f32.mrf.mxu0 }
  0xa1   :  { %v106_v27 = vadd.f32 %v357_v25, %v105_v26 }
  0xa3   :  { %v109_v28 = vmax.f32 %v106_v27, 0.0 }
  0xa5   :  { %v110_v29 = vpack.c.bf16 %v109_v28, %v109_v28 }
  0xa7   :  { %187 = vmatmul.bf16.vlgmr.msra.gmra.mxu1 %v110_v29 }
  0xa8   :  { %v107_v30 = vpop.f32.mrf.mxu0 }
 0x124   :  { %v188_v34 = vpop.f32.mrf.mxu1 }
 0x125   :  { %v189_v35 = vadd.f32 %v358_v33, %v188_v34 }
 0x127   :  { %v192_v36 = vmax.f32 %v189_v35, 0.0 }
 0x129   :  { %v193_v37 = vpack.c.bf16 %v192_v36, %v192_v36 }
 0x12b   :  { %337 = vmatmul.msk.bf16.vlgmr.msra.gmra.mxu2 %vm230_vm3, %v193_v37 }
 0x12c   :  { %v190_v38 = vpop.f32.mrf.mxu1 }
 0x1ae   :  { %v243_v40 = vpop.f32.mrf.mxu2 }
 0x1af   :  { %v244_v41 = vadd.f32 %v359_v39, %v243_v40 }
 0x1b1   :  { %v248_v42 = vsel %vm247_vm4, %v244_v41, -inf }
 0x1b2   :  { %249 = vmax.xlane.f32.xlu0 %v248_v42 }
 0x1b6   :  { %v245_v43 = vpop.f32.mrf.mxu2 }
 0x225   :  { %v250_v44 = vpop.xlane.xlu0 %249 }
 0x226   :  { %v251_v45 = vsub.f32 %v244_v41, %v250_v44 }
 0x228   :  { %v252_v46 = vmul.f32 1.442695, %v251_v45 }
 0x22a   :  { %360 = vpow2.f32 %v252_v46 }
 0x230   :  { %v361_v47 = vpop.eup %360 }
 0x231   :  { %v254_v48 = vsel %vm247_vm4, %v361_v47, 0.0 }
 0x232   :  { %255 = vadd.xlane.f32.xlu0 %v254_v48 }
 0x2a5   :  { %v256_v49 = vpop.xlane.xlu0 %255 }
 0x2a6   :  { %362 = vrcp.f32 %v256_v49 }
 0x2ac   :  { %v363_v50 = vpop.eup %362 }
 0x2ad   :  { %v258_v51 = vmul.f32 %v363_v50, %v361_v47 }
 0x2af   :  { %259 = vst.msk [vmem:[%s487_s7] sm:$0xff] %vm247_vm4, %v258_v51 }

</bundles_post_ra>
